<compile_context>
chip_gen: v7x
topology: tpu7x:2x2x1
jax: 0.10.0
libtpu: 0.0.40
codegen_flags: <defaults>
</compile_context>

<pallas_src>
import functools

import jax
import jax.numpy as jnp
from jax import lax
from jax.experimental import pallas as pl
from jax.experimental.pallas import tpu as pltpu


# ----------------------------- hardware-aware config ----------------------- #

def _tpu_config():
    """Returns (physical VMEM bytes, chip has 2 TensorCores)."""
    try:
        vmem = int(pltpu.get_tpu_info().vmem_capacity_bytes)
    except Exception:
        vmem = 64 << 20  # conservative default (v7x-sized VMEM)
    # Heuristic: 64 MiB-VMEM parts (v7x) have 2 TensorCores per chip; the
    # 128 MiB parts (v5e/v6e) have 1, so no need to force >= 2 grid programs.
    two_tc = vmem <= (64 << 20)
    return vmem, two_tc


def _choose_block_b(B, T, C, itemsize, vmem_cap, two_tc,
                    target_bytes=4 << 20, n_f32_temps=3):
    """Batch rows per grid step: ~target_bytes payload, VMEM-bounded, and on
    2-TC chips keep >= 2 grid programs when B >= 2 so both cores get work."""
    per_row_in = max(1, T * C * itemsize)
    # Steady-state VMEM per batch row: double-buffered input + output blocks
    # plus the live f32 full-tile temporaries inside the kernel body.
    per_row_vmem = 4 * per_row_in + n_f32_temps * T * C * 4
    bb_vmem = max(1, int(0.6 * vmem_cap) // max(per_row_vmem, 1))
    bb_tgt = max(1, target_bytes // per_row_in)
    bb = max(1, min(bb_vmem, bb_tgt, B))
    if two_tc and B >= 2:
        bb = min(bb, pl.cdiv(B, 2))
    return bb


def _vmem_limit(bb, T, C, itemsize, vmem_cap, n_f32_temps=3):
    blk_in = bb * T * C * itemsize
    blk_f32 = bb * T * C * 4
    # Double-buffered in/out blocks + live f32 temporaries + slack.
    needed = 4 * blk_in + n_f32_temps * blk_f32 + (2 << 20)
    cap = int(0.75 * vmem_cap)  # ~48 MiB on v7x, ~96 MiB on 128 MiB v5e/v6e
    # TODO(synk): add a T-tiled fallback (second "arbitrary" grid axis with
    # f32 scratch accumulators) so very long sequences at bb=1 cannot exceed
    # the VMEM cap and a B=1 workload still feeds both v7x TensorCores.
    return int(min(max(needed, 32 << 20), cap))


def _is_low_precision(dtype):
    return jnp.issubdtype(dtype, jnp.floating) and jnp.dtype(dtype).itemsize == 2


# ----------------------------- kernels ------------------------------------- #

def _revin_norm_kernel(x_ref, w_ref, b_ref, y_ref, mean_ref, std_ref, *,
                       eps, affine, low_precision):
    x = x_ref[...]                                        # (Bb, T, C)
    if low_precision:
        # bf16/f16 elementwise; reductions accumulate in f32.
        mean = jnp.mean(x, axis=1, keepdims=True, dtype=jnp.float32)
        d = x - mean.astype(x.dtype)
        var = jnp.mean(d * d, axis=1, keepdims=True, dtype=jnp.float32)
        inv_std = lax.rsqrt(var + eps)                    # per-(b,c), EUP slot
        if affine:
            scale = (w_ref[...] * inv_std).astype(x.dtype)
            y = d * scale + b_ref[...].astype(x.dtype)
        else:
            y = d * inv_std.astype(x.dtype)
    else:
        xf = x.astype(jnp.float32)
        # Two-pass mean/var (unbiased=False); safer than E[x^2] - mean^2.
        mean = jnp.mean(xf, axis=1, keepdims=True)        # (Bb, 1, C)
        d = xf - mean
        var = jnp.mean(d * d, axis=1, keepdims=True)      # (Bb, 1, C)
        inv_std = lax.rsqrt(var + eps)
        if affine:
            # (x - mean)/std * w + b == d * (w*inv_std) + b : one mul+add/elem.
            y = d * (w_ref[...] * inv_std) + b_ref[...]
        else:
            y = d * inv_std
    y_ref[...] = y.astype(y_ref.dtype)
    mean_ref[...] = mean.astype(mean_ref.dtype)
    std_ref[...] = jnp.sqrt(var + eps).astype(std_ref.dtype)


def _revin_denorm_kernel(x_ref, mean_ref, std_ref, w_ref, b_ref, y_ref, *,
                         eps, affine, low_precision):
    # Per-(b,c) scale/shift computed once (tiny), then one mul+add per element:
    #   affine:    y = (x - b)/(w + eps^2) * std + mean  =  x*scale + shift
    #   no affine: y = x*std + mean
    if affine:
        inv_w = pl.reciprocal(w_ref[...] + eps * eps)     # (1,1,C), exact
        scale = std_ref[...] * inv_w                      # (Bb,1,C)
        shift = mean_ref[...] - b_ref[...] * scale        # (Bb,1,C)
    else:
        scale = std_ref[...]
        shift = mean_ref[...]
    x = x_ref[...]
    if low_precision:
        y = x * scale.astype(x.dtype) + shift.astype(x.dtype)
    else:
        y = x.astype(jnp.float32) * scale + shift
    y_ref[...] = y.astype(y_ref.dtype)


# ----------------------------- wrappers ------------------------------------ #

def revin_norm(x, weight, bias, eps=1e-5, affine=True):
    """mode == 'norm': returns (x_normalized, mean, stdev)."""
    B, T, C = x.shape
    vmem_cap, two_tc = _tpu_config()
    itemsize = jnp.dtype(x.dtype).itemsize
    low_precision = _is_low_precision(x.dtype)

    if weight is None:
        weight = jnp.ones((C,), jnp.float32)
    if bias is None:
        bias = jnp.zeros((C,), jnp.float32)
    w = weight.reshape(1, 1, C).astype(jnp.float32)
    b = bias.reshape(1, 1, C).astype(jnp.float32)

    n_temps = 2 if low_precision else 3
    bb = _choose_block_b(B, T, C, itemsize, vmem_cap, two_tc,
                         n_f32_temps=n_temps)
    grid = (pl.cdiv(B, bb),)  # ragged tail block handled by Pallas masking

    x_spec = pl.BlockSpec((bb, T, C), lambda i: (i, 0, 0))
    param_spec = pl.BlockSpec((1, 1, C), lambda i: (0, 0, 0))
    stat_spec = pl.BlockSpec((bb, 1, C), lambda i: (i, 0, 0))

    cost = pl.CostEstimate(
        flops=int(6 * B * T * C),
        transcendentals=int(2 * B * C),
        bytes_accessed=int(2 * B * T * C * itemsize + 2 * B * C * 4),
    )

    y, mean, std = pl.pallas_call(
        functools.partial(_revin_norm_kernel, eps=float(eps), affine=affine,
                          low_precision=low_precision),
        out_shape=(
            jax.ShapeDtypeStruct((B, T, C), x.dtype),
            jax.ShapeDtypeStruct((B, 1, C), jnp.float32),
            jax.ShapeDtypeStruct((B, 1, C), jnp.float32),
        ),
        grid_spec=pltpu.PrefetchScalarGridSpec(
            num_scalar_prefetch=0,
            grid=grid,
            in_specs=[x_spec, param_spec, param_spec],
            out_specs=[x_spec, stat_spec, stat_spec],
        ),
        compiler_params=pltpu.CompilerParams(
            dimension_semantics=("parallel",),
            vmem_limit_bytes=_vmem_limit(bb, T, C, itemsize, vmem_cap,
                                         n_f32_temps=n_temps),
        ),
        cost_estimate=cost,
    )(x, w, b)

    return y, mean, std


def revin_denorm(x, mean, std, weight, bias, eps=1e-5, affine=True):
    """mode == 'denorm': inverse transform using saved mean/stdev."""
    B, T, C = x.shape
    vmem_cap, two_tc = _tpu_config()
    itemsize = jnp.dtype(x.dtype).itemsize
    low_precision = _is_low_precision(x.dtype)

    if weight is None:
        weight = jnp.ones((C,), jnp.float32)
    if bias is None:
        bias = jnp.zeros((C,), jnp.float32)
    w = weight.reshape(1, 1, C).astype(jnp.float32)
    b = bias.reshape(1, 1, C).astype(jnp.float32)
    mp = mean.reshape(B, 1, C).astype(jnp.float32)
    sp = std.reshape(B, 1, C).astype(jnp.float32)

    n_temps = 1
    bb = _choose_block_b(B, T, C, itemsize, vmem_cap, two_tc,
                         n_f32_temps=n_temps)
    grid = (pl.cdiv(B, bb),)

    x_spec = pl.BlockSpec((bb, T, C), lambda i: (i, 0, 0))
    param_spec = pl.BlockSpec((1, 1, C), lambda i: (0, 0, 0))
    stat_spec = pl.BlockSpec((bb, 1, C), lambda i: (i, 0, 0))

    cost = pl.CostEstimate(
        flops=int(2 * B * T * C),
        transcendentals=0,
        bytes_accessed=int(2 * B * T * C * itemsize + 2 * B * C * 4),
    )

    y = pl.pallas_call(
        functools.partial(_revin_denorm_kernel, eps=float(eps), affine=affine,
                          low_precision=low_precision),
        out_shape=jax.ShapeDtypeStruct((B, T, C), x.dtype),
        grid_spec=pltpu.PrefetchScalarGridSpec(
            num_scalar_prefetch=0,
            grid=grid,
            in_specs=[x_spec, stat_spec, stat_spec, param_spec, param_spec],
            out_specs=x_spec,
        ),
        compiler_params=pltpu.CompilerParams(
            dimension_semantics=("parallel",),
            vmem_limit_bytes=_vmem_limit(bb, T, C, itemsize, vmem_cap,
                                         n_f32_temps=n_temps),
        ),
        cost_estimate=cost,
    )(x, mp, sp, w, b)

    return y


class RevIN:
    """JAX/Pallas port of the PyTorch RevIN module."""

    def __init__(self, num_features: int, eps: float = 1e-5, affine: bool = True):
        self.num_features = num_features
        self.eps = float(eps)
        self.affine = affine
        if affine:
            # Mirrors nn.Parameter(torch.ones/zeros(num_features)).
            self.affine_weight = jnp.ones((num_features,), jnp.float32)
            self.affine_bias = jnp.zeros((num_features,), jnp.float32)
        else:
            self.affine_weight = None
            self.affine_bias = None
        self.mean = None
        self.stdev = None

    def __call__(self, x, mode: str):
        if mode == "norm":
            y, self.mean, self.stdev = revin_norm(
                x, self.affine_weight, self.affine_bias, self.eps, self.affine)
            return y
        elif mode == "denorm":
            return revin_denorm(
                x, self.mean, self.stdev, self.affine_weight, self.affine_bias,
                self.eps, self.affine)
        else:
            raise NotImplementedError


# ----------------------------- reference ----------------------------------- #

def _ref_norm(x, w, b, eps):
    mean = jnp.mean(x, axis=1, keepdims=True)
    var = jnp.var(x, axis=1, keepdims=True)  # ddof=0 == unbiased=False
    std = jnp.sqrt(var + eps)
    return (x - mean) / std * w + b, mean, std


def _ref_denorm(x, mean, std, w, b, eps):
    x = (x - b) / (w + eps * eps)
    return x * std + mean


# ----------------------------- main ----------------------------------------- #

if __name__ == "__main__":
    key = jax.random.PRNGKey(0)
    B, T, C = 2, 8, 32  # batch, seq_len, num_features
    EPS = 1e-5
    x = jax.random.normal(key, (B, T, C), dtype=jnp.float32) * 3.0 + 1.5

    revin = RevIN(num_features=C, eps=EPS, affine=True)

    # norm
    y = revin(x, "norm")
    y = jax.block_until_ready(y)

    # denorm (round trip)
    x_rec = revin(y, "denorm")
    x_rec = jax.block_until_ready(x_rec)

    # check against pure-JAX reference
    w_r = revin.affine_weight.reshape(1, 1, C)
    b_r = revin.affine_bias.reshape(1, 1, C)
    y_ref, m_ref, s_ref = _ref_norm(x, w_r, b_r, EPS)
    xr_ref = _ref_denorm(y_ref, m_ref, s_ref, w_r, b_r, EPS)

    assert jnp.allclose(y, y_ref, atol=1e-5, rtol=1e-5)
    assert jnp.allclose(revin.mean[:, 0, :], m_ref[:, 0, :], atol=1e-5, rtol=1e-5)
    assert jnp.allclose(revin.stdev[:, 0, :], s_ref[:, 0, :], atol=1e-5, rtol=1e-5)
    assert jnp.allclose(x_rec, xr_ref, atol=1e-4, rtol=1e-4)
    assert jnp.allclose(x_rec, x, atol=1e-3, rtol=1e-3)  # round-trip recovers input

    # affine=False path (exactly skips the affine inverse, like PyTorch)
    revin_na = RevIN(num_features=C, eps=EPS, affine=False)
    y_na = jax.block_until_ready(revin_na(x, "norm"))
    x_na_rec = jax.block_until_ready(revin_na(y_na, "denorm"))
    mean_na = jnp.mean(x, axis=1, keepdims=True)
    std_na = jnp.sqrt(jnp.var(x, axis=1, keepdims=True) + EPS)
    assert jnp.allclose(y_na, (x - mean_na) / std_na, atol=1e-5, rtol=1e-5)
    assert jnp.allclose(x_na_rec, x, atol=1e-3, rtol=1e-3)

    print("KERNEL_OK")
</pallas_src>

<mosaic_0001>
module attributes {stable_mosaic.version = 11 : i64} {
  func.func @_revin_norm_kernel(%arg0: i32, %arg1: memref<1x8x32xf32, #tpu.memory_space<vmem>>, %arg2: memref<1x1x32xf32, #tpu.memory_space<vmem>>, %arg3: memref<1x1x32xf32, #tpu.memory_space<vmem>>, %arg4: memref<1x8x32xf32, #tpu.memory_space<vmem>>, %arg5: memref<1x1x32xf32, #tpu.memory_space<vmem>>, %arg6: memref<1x1x32xf32, #tpu.memory_space<vmem>>) attributes {dimension_semantics = [#tpu.dimension_semantics<parallel>], iteration_bounds = array<i64: 2>, scalar_prefetch = 0 : i64, scratch_operands = 0 : i64, tpu.core_type = #tpu.core_type<tc>, window_params = [{transform_indices = @transform_0, window_bounds = array<i64: 1, 8, 32>}, {pipeline_mode = #tpu.pipeline_mode<synchronous>, transform_indices = @transform_1, window_bounds = array<i64: 1, 1, 32>}, {pipeline_mode = #tpu.pipeline_mode<synchronous>, transform_indices = @transform_2, window_bounds = array<i64: 1, 1, 32>}, {transform_indices = @transform_3, window_bounds = array<i64: 1, 8, 32>}, {transform_indices = @transform_4, window_bounds = array<i64: 1, 1, 32>}, {transform_indices = @transform_5, window_bounds = array<i64: 1, 1, 32>}]} {
    %c0 = arith.constant 0 : index
    %c0_0 = arith.constant 0 : index
    %c0_1 = arith.constant 0 : index
    %0 = vector.load %arg1[%c0, %c0_0, %c0_1] : memref<1x8x32xf32, #tpu.memory_space<vmem>>, vector<1x8x32xf32>
    %cst = arith.constant dense<0.000000e+00> : vector<1x32xf32>
    %1 = vector.multi_reduction <add>, %0, %cst [1] : vector<1x8x32xf32> to vector<1x32xf32>
    %2 = vector.shape_cast %1 : vector<1x32xf32> to vector<1x1x32xf32>
    %cst_2 = arith.constant 8.000000e+00 : f32
    %3 = vector.broadcast %cst_2 : f32 to vector<1x1x32xf32>
    %4 = arith.divf %2, %3 : vector<1x1x32xf32>
    %5 = vector.broadcast %4 : vector<1x1x32xf32> to vector<1x8x32xf32>
    %6 = arith.subf %0, %5 : vector<1x8x32xf32>
    %7 = arith.mulf %6, %6 : vector<1x8x32xf32>
    %cst_3 = arith.constant dense<0.000000e+00> : vector<1x32xf32>
    %8 = vector.multi_reduction <add>, %7, %cst_3 [1] : vector<1x8x32xf32> to vector<1x32xf32>
    %9 = vector.shape_cast %8 : vector<1x32xf32> to vector<1x1x32xf32>
    %cst_4 = arith.constant 8.000000e+00 : f32
    %10 = vector.broadcast %cst_4 : f32 to vector<1x1x32xf32>
    %11 = arith.divf %9, %10 : vector<1x1x32xf32>
    %cst_5 = arith.constant 9.99999974E-6 : f32
    %12 = vector.broadcast %cst_5 : f32 to vector<1x1x32xf32>
    %13 = arith.addf %11, %12 : vector<1x1x32xf32>
    %14 = math.rsqrt %13 : vector<1x1x32xf32>
    %c0_6 = arith.constant 0 : index
    %c0_7 = arith.constant 0 : index
    %c0_8 = arith.constant 0 : index
    %15 = vector.load %arg2[%c0_6, %c0_7, %c0_8] : memref<1x1x32xf32, #tpu.memory_space<vmem>>, vector<1x1x32xf32>
    %16 = arith.mulf %15, %14 : vector<1x1x32xf32>
    %17 = vector.broadcast %16 : vector<1x1x32xf32> to vector<1x8x32xf32>
    %18 = arith.mulf %6, %17 : vector<1x8x32xf32>
    %c0_9 = arith.constant 0 : index
    %c0_10 = arith.constant 0 : index
    %c0_11 = arith.constant 0 : index
    %19 = vector.load %arg3[%c0_9, %c0_10, %c0_11] : memref<1x1x32xf32, #tpu.memory_space<vmem>>, vector<1x1x32xf32>
    %20 = vector.broadcast %19 : vector<1x1x32xf32> to vector<1x8x32xf32>
    %21 = arith.addf %18, %20 : vector<1x8x32xf32>
    %c0_12 = arith.constant 0 : index
    %c0_13 = arith.constant 0 : index
    %c0_14 = arith.constant 0 : index
    %22 = vector.load %arg4[%c0_12, %c0_13, %c0_14] : memref<1x8x32xf32, #tpu.memory_space<vmem>>, vector<1x8x32xf32>
    tpu.vector_store %arg4[%c0_12, %c0_13, %c0_14], %21 {strides = array<i32>} : memref<1x8x32xf32, #tpu.memory_space<vmem>>, vector<1x8x32xf32>,
    %c0_15 = arith.constant 0 : index
    %c0_16 = arith.constant 0 : index
    %c0_17 = arith.constant 0 : index
    %23 = vector.load %arg5[%c0_15, %c0_16, %c0_17] : memref<1x1x32xf32, #tpu.memory_space<vmem>>, vector<1x1x32xf32>
    tpu.vector_store %arg5[%c0_15, %c0_16, %c0_17], %4 {strides = array<i32>} : memref<1x1x32xf32, #tpu.memory_space<vmem>>, vector<1x1x32xf32>,
    %cst_18 = arith.constant 9.99999974E-6 : f32
    %24 = vector.broadcast %cst_18 : f32 to vector<1x1x32xf32>
    %25 = arith.addf %11, %24 : vector<1x1x32xf32>
    %26 = math.sqrt %25 : vector<1x1x32xf32>
    %c0_19 = arith.constant 0 : index
    %c0_20 = arith.constant 0 : index
    %c0_21 = arith.constant 0 : index
    %27 = vector.load %arg6[%c0_19, %c0_20, %c0_21] : memref<1x1x32xf32, #tpu.memory_space<vmem>>, vector<1x1x32xf32>
    tpu.vector_store %arg6[%c0_19, %c0_20, %c0_21], %26 {strides = array<i32>} : memref<1x1x32xf32, #tpu.memory_space<vmem>>, vector<1x1x32xf32>,
    return
  }
  func.func @transform_0(%arg0: i32) -> (i32, i32, i32) {
    %c0_i32 = arith.constant 0 : i32
    %c0_i32_0 = arith.constant 0 : i32
    %c0_i32_1 = arith.constant 0 : i32
    return %arg0, %c0_i32, %c0_i32_0 : i32, i32, i32
  }
  func.func @transform_1(%arg0: i32) -> (i32, i32, i32) {
    %c0_i32 = arith.constant 0 : i32
    %c0_i32_0 = arith.constant 0 : i32
    %c0_i32_1 = arith.constant 0 : i32
    %c0_i32_2 = arith.constant 0 : i32
    return %c0_i32, %c0_i32_0, %c0_i32_1 : i32, i32, i32
  }
  func.func @transform_2(%arg0: i32) -> (i32, i32, i32) {
    %c0_i32 = arith.constant 0 : i32
    %c0_i32_0 = arith.constant 0 : i32
    %c0_i32_1 = arith.constant 0 : i32
    %c0_i32_2 = arith.constant 0 : i32
    return %c0_i32, %c0_i32_0, %c0_i32_1 : i32, i32, i32
  }
  func.func @transform_3(%arg0: i32) -> (i32, i32, i32) {
    %c0_i32 = arith.constant 0 : i32
    %c0_i32_0 = arith.constant 0 : i32
    %c0_i32_1 = arith.constant 0 : i32
    return %arg0, %c0_i32, %c0_i32_0 : i32, i32, i32
  }
  func.func @transform_4(%arg0: i32) -> (i32, i32, i32) {
    %c0_i32 = arith.constant 0 : i32
    %c0_i32_0 = arith.constant 0 : i32
    %c0_i32_1 = arith.constant 0 : i32
    return %arg0, %c0_i32, %c0_i32_0 : i32, i32, i32
  }
  func.func @transform_5(%arg0: i32) -> (i32, i32, i32) {
    %c0_i32 = arith.constant 0 : i32
    %c0_i32_0 = arith.constant 0 : i32
    %c0_i32_1 = arith.constant 0 : i32
    return %arg0, %c0_i32, %c0_i32_0 : i32, i32, i32
  }
}

</mosaic_0001>

<bundles_post_ra>
// kernel: tpu_custom_call.1
= control target key start
LH: loop header
LB: loop body
LE: loop exit
PB: predicated region body
PF: predicated region fallthrough
CT: control target
= control target key end

     0   :  { %11 = vsyncpa [#allocation3], 0  ;;  %s997_s0 = inlined_call_operand.hbm [shape: f32[2,8,32], index: 0, kind: input, shape index: {}]   ;;  %s998_s1 = inlined_call_operand.vmem [shape: f32[1,1,32], index: 1, kind: input, shape index: {}]   ;;  %s999_s2 = inlined_call_operand.vmem [shape: f32[1,1,32], index: 2, kind: input, shape index: {}]   ;;  %s1000_s3 = inlined_call_operand.hbm [shape: f32[2,8,32], index: 3, kind: output, shape index: {0}]   ;;  %s1001_s4 = inlined_call_operand.hbm [shape: f32[2,1,32], index: 4, kind: output, shape index: {1}]   ;;  %s1002_s5 = inlined_call_operand.hbm [shape: f32[2,1,32], index: 5, kind: output, shape index: {2}]  }
   0x1   :  { %13 = vsyncpa [#allocation3 + $0x1], 0 }
   0x2   :  { %14 = vsyncpa [#allocation4], 0 }
   0x3   :  { %16 = vsyncpa [#allocation4 + $0x1], 0 }
   0x4   :  { %17 = vsyncpa [#allocation7], 0 }
   0x5   :  { %19 = vsyncpa [#allocation7 + $0x1], 0  ;;  %s743_s18 = smov 0   ;;  %s745_s19 = smov 0  }
   0x6   :  { %s747_s20 = smov 0   ;;  %s749_s21 = smov 0  }
   0x7 LB: > { %s764_s22 = sadd.s32 4294967295, %s707_s21   ;;  %s478_s23 = sadd.s32 4294967294, %s707_s21   ;;  %s707_s21 = sphi %s749_s21, %s1017_s21   ;;  %s703_s20 = sphi %s747_s20, %s1016_s20   ;;  %s699_s19 = sphi %s745_s19, %s1015_s19   ;;  %s695_s18 = sphi %s743_s18, %s1014_s18  }
   0x8   : > { %s768_s24 = sadd.s32 1, %s707_s21   ;;  %s32_s25 = sadd.s32 1, %s703_s20 }
   0x9   : > { %s29_s26 = ssub.s32 %s707_s21, %s768_s24  ;;  %p39_p0 = scmp.ne.s32.totalorder %s703_s20, %s699_s19 }
   0xa   : > { %p30_p1 = scmp.eq.s32.totalorder %s29_s26, 0  ;;  %p40_p2 = scmp.eq.s32.totalorder %s707_s21, 0 }
   0xb   : > { %p45_p3 = scmp.ne.s32.totalorder %s699_s19, %s695_s18  ;;  %p46_p4 = scmp.eq.s32.totalorder %s764_s22, 0 }
   0xc   : > { %s780_s27 = scalar_select %p30_p1, %s703_s20, %s32_s25  }
   0xd   : > { %p782_p5 = por %p40_p2, %p39_p0  ;;  %p786_p6 = por %p46_p4, %p45_p3 }
   0xe   : > { %p111_p7 = scmp.eq.s32.totalorder %s764_s22, 1  ;;  %p117_p8 = scmp.eq.s32.totalorder %s478_s23, 1 }
   0xf   : > { %p515_p10 = scmp.lt.s32.totalorder %s707_s21, 2  ;;  %s195_s7 = sand.u32 1, %s703_s20  }
  0x10   : > { %p795_p11 = por %p111_p7, %p39_p0  ;;  %p799_p12 = por %p117_p8, %p45_p3 }
  0x11   : > { %s482_s8 = sshll.u32 %s707_s21, 7  ;;  %s481_s9 = sshll.u32 %s195_s7, 3 }
  0x12   : > { %s1006_s30 = scalar_select %p795_p11, 1, 0 }
  0x13   : > { %s1007_s6 = scalar_select %p799_p12, 1, 0 }
  0x14   : > { %s808_s12 = scalar_lea.hbm %s997_s0, %s482_s8  ;;  %s199_s13 = scalar_lea.vmem [#allocation2], %s481_s9 }
  0x15   : > { %s206_s14 = sshll.u32 %s199_s13, 4  ;;  %p812_p13 = pnand %p515_p10, %p782_p5  ;;  %s816_s14 = int_to_ptr.vmem [resolvable:$true] %s206_s14 }
  0x16   : > { %s196_s16 = scalar_lea.sflag [#allocation3], %s195_s7  ;;  %s551_s17 = scalar_lea.hbm %s808_s12, 128 }
  0x17   : > { %p552_p2 = scmp.ne.s32.totalorder %s808_s12, %s551_s17  ;;  %p553_p3 = pneg %p812_p13 }
  0x18   : > { %s556_s28 = scalar_lea.hbm %s997_s0, 256  ;;  %p557_p5 = scmp.lt.u32.totalorder %s808_s12, %s997_s0 }
  0x19   : > { %p554_p4 = pnand %p553_p3, %p552_p2  ;;  %p558_p8 = scmp.lt.u32.totalorder %s556_s28, %s551_s17 }
  0x1a   : > { %p560_p9 = scmp.lt.u32.totalorder %s551_s17, %s808_s12 }
  0x1b   : > { %p555_p7 = pneg %p554_p4  ;;  %p559_p10 = por %p558_p8, %p557_p5 }
  0x1d   : > { %p561_p0 = por %p560_p9, %p559_p10 }
  0x1f   : > { %p562_p1 = pnand %p561_p0, %p555_p7 }
  0x21   : > { %565 = shalt.err (!%p562_p1)
}
  0x22   : > { %s566_s7 = scalar_lea.vmem %s816_s14, 128  ;;  %s709_s10 = smov [#allocation2]  }
  0x23   : > { %p567_p2 = scmp.ne.s32.totalorder %s816_s14, %s566_s7  ;;  %s571_s11 = sshll.u32 %s709_s10, 4  ;;  %s572_s11 = int_to_ptr.vmem [resolvable:$false] %s571_s11 }
  0x24   : > { %s573_s13 = scalar_lea.vmem %s572_s11, 256  ;;  %p574_p11 = scmp.lt.s32.totalorder %s816_s14, %s572_s11 }
  0x25   : > { %p569_p4 = pnand %p567_p2, %p553_p3  ;;  %p575_p5 = scmp.lt.s32.totalorder %s573_s13, %s566_s7 }
  0x27   : > { %p570_p12 = pneg %p569_p4  ;;  %p576_p8 = por %p575_p5, %p574_p11 }
  0x29   : > { %p577_p9 = pnand %p576_p8, %p570_p12 }
  0x2b   : > { %580 = shalt.err (!%p577_p9)
}
  0x2c   : > { %504 = dma.hbm_to_vmem [thread:$0]  (!%p812_p13), %s808_s12, 128, %s816_s14, %s196_s16  }
  0x2d   : > { %p1009_p0 = scmp.lt.s32.totalorder %s707_s21, 3  ;;  %p1010_p1 = scmp.ge.s32.totalorder %s707_s21, 1 }
  0x2f   : > { %p212_p3 = pnand %p1010_p1, %p1009_p0 }
  0x30   : > { %s850_s17 = sand.u32 (!%p212_p3), 1, %s699_s19  }
  0x31   : > { %215 = sbr.rel (%p212_p3) target bundleno = 157 (0x9d), region = 32  ;;  %s484_s25 = sshll.u32 (!%p212_p3), %s850_s17, 3 }
  0x32   : > { %s218_s26 = scalar_lea.sflag (!%p212_p3), [#allocation3], %s850_s17  ;;  %s221_s15 = scalar_lea.vmem (!%p212_p3), [#allocation2], %s484_s25 }
  0x38   : > { %682 = dma.done.wait (%p786_p6), %s218_s26, 128  }
  0x39   : > { %684 = vsyncadd (%p786_p6), %s218_s26, 4294967168  ;;  %vm257_vm0 = vcmask 261120   ;;  %v256_v0 = vld [vmem:[%s221_s15] sm:$0xff]  ;;  %s249_s12 = scalar_lea.vmem [#allocation6], %s850_s17  ;;  %s312_s16 = sand.u32 1, %s764_s22   ;;  %vm297_vm1 = vcmask 253952  }
  0x3a   : > { %v258_v1 = vsel %vm257_vm0, %v256_v0, 0.0  ;;  %s342_s14 = sshll.u32 %s249_s12, 4  ;;  %s489_s28 = sshll.u32 %s764_s22, 4  ;;  %s864_s14 = int_to_ptr.vmem [resolvable:$true] %s342_s14 }
  0x3b   : > { %v259_v2 = vrot.slane %v258_v1, 4  ;;  %s871_s9 = scalar_lea.hbm %s1001_s4, %s489_s28  ;;  %s874_s7 = scalar_lea.sflag [#allocation7], %s312_s16 }
  0x3c   : > { %s581_s10 = scalar_lea.vmem %s864_s14, 16  ;;  %p1011_p11 = scmp.ne.s32.totalorder %s1006_s30, 0 }
  0x3d   : > { %v260_v3 = vadd.f32 %v259_v2, %v258_v1  ;;  %p582_p6 = scmp.ne.s32.totalorder %s864_s14, %s581_s10  ;;  %s710_s11 = smov [#allocation6]  }
  0x3e   : > { %s585_s13 = sshll.u32 %s710_s11, 4  ;;  %s586_s13 = int_to_ptr.vmem [resolvable:$false] %s585_s13 }
  0x3f   : > { %v261_v4 = vrot.slane %v260_v3, 2  ;;  %p583_p12 = pnand %p582_p6, %p1011_p11  ;;  %s587_s26 = scalar_lea.vmem %s586_s13, 32 }
  0x40   : > { %p588_p7 = scmp.lt.s32.totalorder %s864_s14, %s586_s13  ;;  %p589_p10 = scmp.lt.s32.totalorder %s587_s26, %s581_s10 }
  0x41   : > { %v262_v5 = vadd.f32 %v261_v4, %v260_v3  ;;  %p584_p13 = pneg %p583_p12 }
  0x42   : > { %p590_p2 = por %p589_p10, %p588_p7 }
  0x43   : > { %v263_v6 = vrot.slane %v262_v5, 1 }
  0x44   : > { %p591_p4 = pnand %p590_p2, %p584_p13 }
  0x45   : > { %v264_v7 = vadd.f32 %v263_v6, %v262_v5 }
  0x47   : > { %v266_v8 = vmul.f32 0.125, %v264_v7 }
  0x49   : > { %v267_v9 = vsub.f32 %v256_v0, %v266_v8  ;;  %298 = vst.msk [vmem:[%s249_s12] sm:$0x1] %vm297_vm1, %v266_v8 }
  0x4a   : > { %594 = shalt.err (!%p591_p4)
}
  0x4b   : > { %s595_s15 = scalar_lea.hbm %s871_s9, 16  ;;  %s599_s29 = scalar_lea.hbm %s1001_s4, 32 }
  0x4c   : > { %p596_p5 = scmp.ne.s32.totalorder %s871_s9, %s595_s15  ;;  %p600_p0 = scmp.lt.u32.totalorder %s871_s9, %s1001_s4 }
  0x4d   : > { %p601_p1 = scmp.lt.u32.totalorder %s599_s29, %s595_s15  ;;  %p603_p6 = scmp.lt.u32.totalorder %s595_s15, %s871_s9 }
  0x4e   : > { %p597_p8 = pnand %p596_p5, %p1011_p11 }
  0x4f   : > { %p602_p3 = por %p601_p1, %p600_p0 }
  0x50   : > { %p598_p9 = pneg %p597_p8 }
  0x51   : > { %p604_p12 = por %p603_p6, %p602_p3 }
  0x53   : > { %p605_p13 = pnand %p604_p12, %p598_p9 }
  0x55   : > { %608 = shalt.err (!%p605_p13)
}
  0x56   : > { %496 = dma.vmem_to_hbm [thread:$0]  (%p1011_p11), %s864_s14, 16, %s871_s9, %s874_s7   ;;  %v268_v10 = vmul.f32 %v267_v9, %v267_v9  ;;  %v282_v20 = vlaneseq  ;;  %v279_v22 = vld [vmem:[%s998_s1] sm:$0x1] }
  0x57   : > { %s255_s14 = scalar_lea.vmem [#allocation8], %s850_s17  ;;  %s905_s26 = scalar_lea.vmem [#allocation5], %s484_s25  ;;  %v486_v30 = vld [vmem:[%s999_s2] ss:$0 sm:$0xff] }
  0x58   : > { %v269_v11 = vsel %vm257_vm0, %v268_v10, 0.0  ;;  %v283_v21 = vshrl.u32 %v282_v20, 7  ;;  %s355_s9 = sshll.u32 %s255_s14, 4  ;;  %s329_s15 = sshll.u32 %s905_s26, 4  ;;  %s908_s9 = int_to_ptr.vmem [resolvable:$true] %s355_s9  ;;  %s921_s15 = int_to_ptr.vmem [resolvable:$true] %s329_s15 }
  0x59   : > { %v270_v12 = vrot.slane %v269_v11, 4  ;;  %s915_s29 = scalar_lea.hbm %s1002_s5, %s489_s28  ;;  %s488_s25 = sshll.u32 %s764_s22, 7 }
  0x5a   : > { %v284_v23 = vsub.s32 0, %v283_v21  ;;  %s609_s10 = scalar_lea.vmem %s908_s9, 16  ;;  %s711_s13 = smov [#allocation8]  }
  0x5b   : > { %v271_v13 = vadd.f32 %v270_v12, %v269_v11  ;;  %p610_p7 = scmp.ne.s32.totalorder %s908_s9, %s609_s10  ;;  %s613_s12 = sshll.u32 %s711_s13, 4  ;;  %s614_s12 = int_to_ptr.vmem [resolvable:$false] %s613_s12 }
  0x5c   : > { %s615_s28 = scalar_lea.vmem %s614_s12, 32  ;;  %p616_p4 = scmp.lt.s32.totalorder %s908_s9, %s614_s12 }
  0x5d   : > { %v272_v14 = vrot.slane %v271_v13, 2  ;;  %p611_p10 = pnand %p610_p7, %p1011_p11  ;;  %p617_p5 = scmp.lt.s32.totalorder %s615_s28, %s609_s10 }
  0x5f   : > { %v273_v15 = vadd.f32 %v272_v14, %v271_v13  ;;  %p612_p2 = pneg %p611_p10  ;;  %p618_p8 = por %p617_p5, %p616_p4 }
  0x61   : > { %v274_v16 = vrot.slane %v273_v15, 1  ;;  %p619_p9 = pnand %p618_p8, %p612_p2 }
  0x63   : > { %v275_v17 = vadd.f32 %v274_v16, %v273_v15 }
  0x65   : > { %v276_v18 = vmul.f32 0.125, %v275_v17 }
  0x67   : > { %v277_v19 = vadd.f32 1e-05, %v276_v18 }
  0x69   : > { %549 = vrsqrt.f32 %v277_v19  ;;  %vm301_vm2 = vcmp.eq.f32.partialorder %v277_v19, inf  ;;  %v304_v25 = vand.u32 2147483648, %v277_v19  ;;  %vm303_vm3 = vcmp.eq.f32.partialorder %v277_v19, 0.0 }
  0x73   : > { %v550_v24 = vpop.eup %549 }
  0x74   : > { %v280_v26 = vmul.f32 %v550_v24, %v279_v22  ;;  %v300_v27 = vmul.f32 %v550_v24, %v277_v19 }
  0x76   : > { %v285_v28 = vrot.slane %v280_v26, %v284_v23  ;;  %v302_v29 = vsel %vm301_vm2, %v277_v19, %v300_v27 }
  0x77   : > { %v305_v31 = vsel %vm303_vm3, %v304_v25, %v302_v29 }
  0x78   : > { %v287_v32 = vmul.f32 %v285_v28, %v267_v9  ;;  %306 = vst.msk [vmem:[%s255_s14] sm:$0x1] %vm297_vm1, %v305_v31 }
  0x79   : > { %622 = shalt.err (!%p619_p9)
}
  0x7a   : > { %s623_s14 = scalar_lea.hbm %s915_s29, 16  ;;  %s627_s11 = scalar_lea.hbm %s1002_s5, 32 }
  0x7b   : > { %p624_p0 = scmp.ne.s32.totalorder %s915_s29, %s623_s14  ;;  %p628_p6 = scmp.lt.u32.totalorder %s915_s29, %s1002_s5 }
  0x7c   : > { %p629_p12 = scmp.lt.u32.totalorder %s627_s11, %s623_s14  ;;  %p631_p7 = scmp.lt.u32.totalorder %s623_s14, %s915_s29 }
  0x7d   : > { %p625_p1 = pnand %p624_p0, %p1011_p11 }
  0x7e   : > { %p630_p13 = por %p629_p12, %p628_p6 }
  0x7f   : > { %p626_p3 = pneg %p625_p1 }
  0x80   : > { %p632_p10 = por %p631_p7, %p630_p13 }
  0x82   : > { %p633_p2 = pnand %p632_p10, %p626_p3 }
  0x84   : > { %636 = shalt.err (!%p633_p2)
}
  0x85   : > { %497 = dma.vmem_to_hbm [thread:$0]  (%p1011_p11), %s908_s9, 16, %s915_s29, %s874_s7   ;;  %v295_v33 = vadd.f32 %v486_v30, %v287_v32 }
  0x86   : > { %s951_s14 = scalar_lea.hbm %s1000_s3, %s488_s25  ;;  %s308_s16 = scalar_lea.sflag [#allocation4], %s850_s17 }
  0x87   : > { %296 = vst.msk [vmem:[%s905_s26] sm:$0xff] %vm257_vm0, %v295_v33  ;;  %s637_s8 = scalar_lea.vmem %s921_s15, 128  ;;  %s712_s11 = smov [#allocation5]  }
  0x88   : > { %p638_p4 = scmp.ne.s32.totalorder %s921_s15, %s637_s8  ;;  %s641_s13 = sshll.u32 %s712_s11, 4  ;;  %s642_s13 = int_to_ptr.vmem [resolvable:$false] %s641_s13 }
  0x89   : > { %s643_s12 = scalar_lea.vmem %s642_s13, 256  ;;  %p644_p9 = scmp.lt.s32.totalorder %s921_s15, %s642_s13 }
  0x8a   : > { %p639_p5 = pnand %p638_p4, %p1011_p11  ;;  %p645_p0 = scmp.lt.s32.totalorder %s643_s12, %s637_s8 }
  0x8c   : > { %p640_p8 = pneg %p639_p5  ;;  %p646_p1 = por %p645_p0, %p644_p9 }
  0x8e   : > { %p647_p3 = pnand %p646_p1, %p640_p8 }
  0x90   : > { %650 = shalt.err (!%p647_p3)
}
  0x91   : > { %s651_s22 = scalar_lea.hbm %s951_s14, 128  ;;  %s655_s9 = scalar_lea.hbm %s1000_s3, 256 }
  0x92   : > { %p652_p6 = scmp.ne.s32.totalorder %s951_s14, %s651_s22  ;;  %p656_p7 = scmp.lt.u32.totalorder %s951_s14, %s1000_s3 }
  0x93   : > { %p657_p10 = scmp.lt.u32.totalorder %s655_s9, %s651_s22  ;;  %p659_p4 = scmp.lt.u32.totalorder %s651_s22, %s951_s14 }
  0x94   : > { %p653_p12 = pnand %p652_p6, %p1011_p11 }
  0x95   : > { %p658_p2 = por %p657_p10, %p656_p7 }
  0x96   : > { %p654_p13 = pneg %p653_p12 }
  0x97   : > { %p660_p5 = por %p659_p4, %p658_p2 }
  0x99   : > { %p661_p8 = pnand %p660_p5, %p654_p13 }
  0x9b   : > { %664 = shalt.err (!%p661_p8)
}
  0x9c   : > { %495 = dma.vmem_to_hbm [thread:$0]  (%p1011_p11), %s921_s15, 128, %s951_s14, %s308_s16  }
  0x9d PF: > { %s367_s25 = sand.u32 1, %s695_s18   ;;  %p1012_p9 = scmp.ne.s32.totalorder %s1007_s6, 0 }
  0x9e   : > { %p1013_p0 = scmp.ge.s32.totalorder %s707_s21, 2  ;;  %s368_s10 = scalar_lea.sflag [#allocation4], %s367_s25 }
  0xa0   : > { %p506_p1 = pnand %p1013_p0, %p1012_p9 }
  0xa2   : > { %686 = dma.done.wait (!%p506_p1), %s368_s10, 128  }
  0xa3   : > { %688 = vsyncadd (!%p506_p1), %s368_s10, 4294967168  ;;  %s376_s28 = sand.u32 1, %s478_s23  }
  0xa4   : > { %s377_s8 = scalar_lea.sflag [#allocation7], %s376_s28 }
  0xa5   : > { %690 = dma.done.wait (!%p506_p1), %s377_s8, 32  }
  0xa6   : > { %692 = vsyncadd (!%p506_p1), %s377_s8, 4294967264  ;;  %p22_p11 = scmp.ge.s32.totalorder %s768_s24, 4   ;;  %s1014_s18 = smov %s699_s19 }
  0xa7   : > { %s1015_s19 = smov %s703_s20  ;;  %s1016_s20 = smov %s780_s27 }
  0xa8   : > { %s1017_s21 = smov %s768_s24  ;;  %24 = sbr.rel (!%p22_p11) target bundleno = 7 (0x7), region = 109 }
  0xaf   :  { %389 = vsyncpa [#allocation3], 1 }
  0xb0   :  { %391 = vsyncpa [#allocation3 + $0x1], 1 }
  0xb1   :  { %392 = vsyncpa [#allocation4], 1 }
  0xb2   :  { %394 = vsyncpa [#allocation4 + $0x1], 1 }
  0xb3   :  { %395 = vsyncpa [#allocation7], 1 }
  0xb4   :  { %397 = vsyncpa [#allocation7 + $0x1], 1 }

</bundles_post_ra>
